<compile_context>
chip_gen: v7x
topology: tpu7x:2x2x1
jax: 0.10.0
libtpu: 0.0.40
codegen_flags: <defaults>
</compile_context>

<pallas_src>
import functools

import jax
import jax.numpy as jnp
from jax import lax
from jax.experimental import pallas as pl
from jax.experimental.pallas import tpu as pltpu


def _round_up(n, m):
    return ((n + m - 1) // m) * m


def _vmem_limit_bytes():
    """Per-generation VMEM budget (v5e/v6e: ~110 MiB, v7x: ~56 MiB)."""
    try:
        cap = int(pltpu.get_tpu_info().vmem_capacity_bytes)
    except Exception:
        cap = 64 * 1024 * 1024
    return max(32 * 1024 * 1024, min(cap - (8 << 20), 110 << 20))


def _ssm_kernel(x_ref,                      # (TL, BB, Hp)  time-major input chunk
                wab_ref, bab_ref,           # fused A_proj|B: (Hp, 2Hp) bf16, (1, 2Hp) f32
                a_ref,                      # A parameter: (1, Hp) f32
                wc_ref, bcd_ref,            # C weight (Hp, Hp) bf16, fused bias bC+D (1, Hp)
                wp_ref, bp_ref,             # projection: (Hp, Hp) bf16, (1, Hp) f32
                out_ref,                    # (TL, BB, Hp) time-major output chunk
                h_ref,                      # (BB, Hp) f32 carried hidden state (scratch)
                hs_ref,                     # (TL, BB, Hp) f32 per-chunk h_t sequence (scratch)
                *, seq_len=None):
    TL, BB, Hp = x_ref.shape

    # Reset the carried state at the start of every batch block's sequence.
    # Correctness relies on the L axis being the innermost ("arbitrary") grid
    # axis with batch outer.
    @pl.when(pl.program_id(1) == 0)
    def _():
        h_ref[...] = jnp.zeros_like(h_ref)

    # Time-major rows: row r = t*BB + b.  BB == 8 and Hp % 128 == 0, so this
    # reshape is tile-preserving and every [t] slice below is a dense slab.
    xf = x_ref[...].reshape(TL * BB, Hp)

    # ---- fused bulk input projections on the MXU (bf16 operands, f32 acc) ----
    ab = jnp.dot(xf.astype(jnp.bfloat16), wab_ref[...],
                 preferred_element_type=jnp.float32) + bab_ref[...]
    a_gate = jnp.exp(a_ref[...] * jax.nn.sigmoid(ab[:, :Hp]))   # A_t   (f32, EUP)
    bx = ab[:, Hp:]                                             # B(x_t) (f32)

    if seq_len is not None:
        # Mask padded trailing timesteps: a=1, b=0 keeps h exactly unchanged.
        t_glob = (pl.program_id(1) * TL
                  + lax.broadcasted_iota(jnp.int32, (TL * BB, 1), 0) // BB)
        valid = t_glob < seq_len
        a_gate = jnp.where(valid, a_gate, 1.0)
        bx = jnp.where(valid, bx, 0.0)

    a3 = a_gate.reshape(TL, BB, Hp)
    b3 = bx.reshape(TL, BB, Hp)

    # ---- sequential selective scan, unrolled over the chunk (f32 VPU) ----
    # Only one h stays live; every h_t streams straight into VMEM scratch.
    h = h_ref[...]
    for t in range(TL):
        h = a3[t] * h + b3[t]
        hs_ref[t] = h
    h_ref[...] = h            # carry into the next L-chunk of this batch block

    # ---- per-chunk epilogue: y = C(h) + (bC + D) + x ; out = P(y) + bP ----
    hsf = hs_ref[...].reshape(TL * BB, Hp)
    y = (jnp.dot(hsf.astype(jnp.bfloat16), wc_ref[...],
                 preferred_element_type=jnp.float32) + bcd_ref[...] + xf)
    o = (jnp.dot(y.astype(jnp.bfloat16), wp_ref[...],
                 preferred_element_type=jnp.float32) + bp_ref[...])
    out_ref[...] = o.reshape(TL, BB, Hp).astype(out_ref.dtype)


def prepack_params(params):
    """One-time weight prep (pad to Hp, fuse A_proj|B and bC+D, bf16 cast).

    Hoisted out of the per-call path so the pallas_call is the only per-forward
    work.  Zero-padding is exact: padded lanes give a_gate = 1, bx = 0, h = 0,
    out = 0, and never leak into real lanes.
    """
    H = params["wA"].shape[0]
    Hp = _round_up(H, 128)
    pad_w = lambda w: jnp.pad(w, ((0, Hp - H), (0, Hp - H)))
    pad_b = lambda b: jnp.pad(b, ((0, 0), (0, Hp - H)))

    return dict(
        w_ab=jnp.concatenate([pad_w(params["wA"]), pad_w(params["wB"])],
                             axis=1).astype(jnp.bfloat16),          # (Hp, 2Hp)
        b_ab=jnp.concatenate([pad_b(params["bA"]), pad_b(params["bB"])], axis=1),
        a=pad_b(params["A"]),
        w_c=pad_w(params["wC"]).astype(jnp.bfloat16),
        b_cd=pad_b(params["bC"] + params["D"]),
        w_p=pad_w(params["wP"]).astype(jnp.bfloat16),
        b_p=pad_b(params["bP"]),
    )


@jax.jit
def state_space_layer(x, packed):
    """x: (B, L, H) float32, packed = prepack_params(...) -> (B, L, H) float32."""
    B, L, H = x.shape
    Hp = packed["a"].shape[1]

    BB = 8                                     # batch block (sublane-dense)
    Bp = _round_up(B, BB)                      # padded batch (zero rows, sliced off)
    TL = _round_up(L, 8) if L <= 64 else 32    # timesteps per chunk: BB*TL >= 256 for long L
    Lp = _round_up(L, TL)

    # Pad and go time-major: (Lp, Bp, Hp).  Lane dim unchanged, so the
    # transposes are cheap and every in-kernel access stays lane/sublane-dense.
    xp = jnp.pad(x, ((0, Bp - B), (0, Lp - L), (0, Hp - H)))
    x_tm = jnp.transpose(xp, (1, 0, 2))

    kernel = functools.partial(_ssm_kernel,
                               seq_len=(L if Lp != L else None))

    const = lambda b, l: (0, 0)
    # Constant-index weight/bias blocks: single buffer (DMA'd once, resident).
    wspec = lambda shape: pl.BlockSpec(shape, const, pipeline_mode=pl.Buffered(1))

    out_tm = pl.pallas_call(
        kernel,
        out_shape=jax.ShapeDtypeStruct((Lp, Bp, Hp), x.dtype),
        grid=(Bp // BB, Lp // TL),
        in_specs=[
            pl.BlockSpec((TL, BB, Hp), lambda b, l: (l, b, 0)),   # x chunk (double-buffered)
            wspec((Hp, 2 * Hp)),                                  # wA | wB (fused)
            wspec((1, 2 * Hp)),                                   # bA | bB (fused)
            wspec((1, Hp)),                                       # A parameter
            wspec((Hp, Hp)),                                      # wC
            wspec((1, Hp)),                                       # bC + D (fused)
            wspec((Hp, Hp)),                                      # wP
            wspec((1, Hp)),                                       # bP
        ],
        out_specs=pl.BlockSpec((TL, BB, Hp), lambda b, l: (l, b, 0)),
        scratch_shapes=[
            pltpu.VMEM((BB, Hp), jnp.float32),       # carried hidden state
            pltpu.VMEM((TL, BB, Hp), jnp.float32),   # per-chunk h_t sequence
        ],
        compiler_params=pltpu.CompilerParams(
            dimension_semantics=("parallel", "arbitrary"),
            vmem_limit_bytes=_vmem_limit_bytes()),
        cost_estimate=pl.CostEstimate(
            flops=8 * Bp * Lp * Hp * Hp,             # 4 Hp x Hp matmuls per token
            transcendentals=2 * Bp * Lp * Hp,        # sigmoid + exp
            bytes_accessed=2 * Bp * Lp * Hp * 4 + 8 * Hp * Hp),
    )(x_tm, packed["w_ab"], packed["b_ab"], packed["a"],
      packed["w_c"], packed["b_cd"], packed["w_p"], packed["b_p"])

    return jnp.transpose(out_tm, (1, 0, 2))[:B, :L, :H]


def init_params(key, hidden_dim):
    ks = jax.random.split(key, 9)

    def lin(kw, kb):
        w = jax.random.normal(kw, (hidden_dim, hidden_dim), jnp.float32) * 0.1
        b = jax.random.normal(kb, (1, hidden_dim), jnp.float32) * 0.01
        return w, b

    wA, bA = lin(ks[0], ks[1])
    wB, bB = lin(ks[2], ks[3])
    wC, bC = lin(ks[4], ks[5])
    wP, bP = lin(ks[6], ks[7])
    A = jax.random.normal(ks[8], (1, hidden_dim), jnp.float32) * 0.1
    D = jnp.zeros((1, hidden_dim), jnp.float32)
    return dict(wA=wA, bA=bA, wB=wB, bB=bB, wC=wC, bC=bC,
                A=A, D=D, wP=wP, bP=bP)


def reference_forward(x, p):
    """Pure-JAX (f32) mirror of the PyTorch forward, for correctness checking."""
    B, L, H = x.shape
    A_input = jax.nn.sigmoid(x @ p["wA"] + p["bA"])        # (B, L, H)
    A = jnp.exp(p["A"] * A_input)                          # (B, L, H)
    Bx = x @ p["wB"] + p["bB"]                             # (B, L, H)

    def step(h, t):
        h = A[:, t] * h + Bx[:, t]
        y = h @ p["wC"] + p["bC"] + p["D"] + x[:, t]
        return h, y

    _, ys = lax.scan(step, jnp.zeros((B, H), jnp.float32), jnp.arange(L))
    out = jnp.transpose(ys, (1, 0, 2))                     # (B, L, H)
    return out @ p["wP"] + p["bP"]


if __name__ == "__main__":
    B, L, H = 2, 8, 32
    key = jax.random.PRNGKey(0)
    kx, kp = jax.random.split(key)
    x = jax.random.normal(kx, (B, L, H), jnp.float32)
    params = init_params(kp, H)

    packed = prepack_params(params)            # one-time weight prepack
    out = jax.block_until_ready(state_space_layer(x, packed))
    ref = reference_forward(x, params)

    assert out.shape == (B, L, H)
    # Tolerance reflects bf16 MXU operands (f32 accumulation) in the kernel;
    # the recurrence / transcendentals / residual remain f32.
    err = float(jnp.max(jnp.abs(out - ref)))
    assert jnp.allclose(out, ref, atol=5e-2, rtol=5e-2), err
    print("KERNEL_OK")
</pallas_src>

<mosaic_0001>
module attributes {stable_mosaic.version = 11 : i64} {
  func.func @_ssm_kernel(%arg0: i32, %arg1: i32, %arg2: memref<8x8x128xf32, #tpu.memory_space<vmem>>, %arg3: memref<128x256xbf16, #tpu.memory_space<vmem>>, %arg4: memref<1x256xf32, #tpu.memory_space<vmem>>, %arg5: memref<1x128xf32, #tpu.memory_space<vmem>>, %arg6: memref<128x128xbf16, #tpu.memory_space<vmem>>, %arg7: memref<1x128xf32, #tpu.memory_space<vmem>>, %arg8: memref<128x128xbf16, #tpu.memory_space<vmem>>, %arg9: memref<1x128xf32, #tpu.memory_space<vmem>>, %arg10: memref<8x8x128xf32, #tpu.memory_space<vmem>>, %arg11: memref<8x128xf32, #tpu.memory_space<vmem>>, %arg12: memref<8x8x128xf32, #tpu.memory_space<vmem>>) attributes {dimension_semantics = [#tpu.dimension_semantics<parallel>, #tpu.dimension_semantics<arbitrary>], iteration_bounds = array<i64: 1, 1>, scalar_prefetch = 0 : i64, scratch_operands = 2 : i64, tpu.core_type = #tpu.core_type<tc>, window_params = [{transform_indices = @transform_0, window_bounds = array<i64: 8, 8, 128>}, {pipeline_mode = #tpu.pipeline_mode<synchronous>, transform_indices = @transform_1, window_bounds = array<i64: 128, 256>}, {pipeline_mode = #tpu.pipeline_mode<synchronous>, transform_indices = @transform_2, window_bounds = array<i64: 1, 256>}, {pipeline_mode = #tpu.pipeline_mode<synchronous>, transform_indices = @transform_3, window_bounds = array<i64: 1, 128>}, {pipeline_mode = #tpu.pipeline_mode<synchronous>, transform_indices = @transform_4, window_bounds = array<i64: 128, 128>}, {pipeline_mode = #tpu.pipeline_mode<synchronous>, transform_indices = @transform_5, window_bounds = array<i64: 1, 128>}, {pipeline_mode = #tpu.pipeline_mode<synchronous>, transform_indices = @transform_6, window_bounds = array<i64: 128, 128>}, {pipeline_mode = #tpu.pipeline_mode<synchronous>, transform_indices = @transform_7, window_bounds = array<i64: 1, 128>}, {transform_indices = @transform_8, window_bounds = array<i64: 8, 8, 128>}]} {
    %c0_i32 = arith.constant 0 : i32
    %0 = arith.cmpi eq, %arg1, %c0_i32 : i32
    %1 = arith.extui %0 : i1 to i32
    %c0_i32_0 = arith.constant 0 : i32
    %2 = arith.cmpi ne, %1, %c0_i32_0 : i32
    scf.if %2 {
      %cst_47 = arith.constant 0.000000e+00 : f32
      %115 = vector.broadcast %cst_47 : f32 to vector<8x128xf32>
      %c0_48 = arith.constant 0 : index
      %c0_49 = arith.constant 0 : index
      %116 = vector.load %arg11[%c0_48, %c0_49] : memref<8x128xf32, #tpu.memory_space<vmem>>, vector<8x128xf32>
      tpu.vector_store %arg11[%c0_48, %c0_49], %115 {strides = array<i32>} : memref<8x128xf32, #tpu.memory_space<vmem>>, vector<8x128xf32>,
    } else {
    }
    %c0 = arith.constant 0 : index
    %c0_1 = arith.constant 0 : index
    %c0_2 = arith.constant 0 : index
    %3 = vector.load %arg2[%c0, %c0_1, %c0_2] : memref<8x8x128xf32, #tpu.memory_space<vmem>>, vector<8x8x128xf32>
    %4 = vector.shape_cast %3 : vector<8x8x128xf32> to vector<64x128xf32>
    %5 = arith.truncf %4 : vector<64x128xf32> to vector<64x128xbf16>
    %c0_3 = arith.constant 0 : index
    %c0_4 = arith.constant 0 : index
    %6 = vector.load %arg3[%c0_3, %c0_4] : memref<128x256xbf16, #tpu.memory_space<vmem>>, vector<128x256xbf16>
    %cst = arith.constant dense<0.000000e+00> : vector<64x256xf32>
    %7 = tpu.matmul %5, %6, %cst {dimension_numbers = #tpu.dot_dimension_numbers<[1], [0], [0], [1], [0, 0, 1, 1], [], []>} : vector<64x128xbf16>, vector<128x256xbf16>, vector<64x256xf32> -> vector<64x256xf32>
    %c0_5 = arith.constant 0 : index
    %c0_6 = arith.constant 0 : index
    %8 = vector.load %arg4[%c0_5, %c0_6] : memref<1x256xf32, #tpu.memory_space<vmem>>, vector<1x256xf32>
    %9 = vector.broadcast %8 : vector<1x256xf32> to vector<64x256xf32>
    %10 = arith.addf %7, %9 : vector<64x256xf32>
    %c0_7 = arith.constant 0 : index
    %c0_8 = arith.constant 0 : index
    %11 = vector.load %arg5[%c0_7, %c0_8] : memref<1x128xf32, #tpu.memory_space<vmem>>, vector<1x128xf32>
    %12 = vector.extract_strided_slice %10 {offsets = [0, 0], sizes = [64, 128], strides = [1, 1]} : vector<64x256xf32> to vector<64x128xf32>
    %13 = arith.negf %12 : vector<64x128xf32>
    %14 = math.exp %13 : vector<64x128xf32>
    %cst_9 = arith.constant 1.000000e+00 : f32
    %15 = vector.broadcast %cst_9 : f32 to vector<64x128xf32>
    %16 = arith.addf %15, %14 : vector<64x128xf32>
    %17 = arith.divf %15, %16 : vector<64x128xf32>
    %18 = vector.broadcast %11 : vector<1x128xf32> to vector<64x128xf32>
    %19 = arith.mulf %18, %17 : vector<64x128xf32>
    %20 = math.exp %19 : vector<64x128xf32>
    %21 = vector.extract_strided_slice %10 {offsets = [0, 128], sizes = [64, 128], strides = [1, 1]} : vector<64x256xf32> to vector<64x128xf32>
    %22 = vector.shape_cast %20 : vector<64x128xf32> to vector<8x8x128xf32>
    %23 = vector.shape_cast %21 : vector<64x128xf32> to vector<8x8x128xf32>
    %c0_10 = arith.constant 0 : index
    %c0_11 = arith.constant 0 : index
    %24 = vector.load %arg11[%c0_10, %c0_11] : memref<8x128xf32, #tpu.memory_space<vmem>>, vector<8x128xf32>
    %25 = vector.extract_strided_slice %22 {offsets = [0, 0, 0], sizes = [1, 8, 128], strides = [1, 1, 1]} : vector<8x8x128xf32> to vector<1x8x128xf32>
    %26 = vector.shape_cast %25 : vector<1x8x128xf32> to vector<8x128xf32>
    %27 = arith.mulf %26, %24 : vector<8x128xf32>
    %28 = vector.extract_strided_slice %23 {offsets = [0, 0, 0], sizes = [1, 8, 128], strides = [1, 1, 1]} : vector<8x8x128xf32> to vector<1x8x128xf32>
    %29 = vector.shape_cast %28 : vector<1x8x128xf32> to vector<8x128xf32>
    %30 = arith.addf %27, %29 : vector<8x128xf32>
    %c0_12 = arith.constant 0 : index
    %c0_13 = arith.constant 0 : index
    %c0_14 = arith.constant 0 : index
    %31 = vector.load %arg12[%c0_12, %c0_13, %c0_14] : memref<8x8x128xf32, #tpu.memory_space<vmem>>, vector<1x8x128xf32>
    %32 = vector.shape_cast %31 : vector<1x8x128xf32> to vector<8x128xf32>
    %33 = vector.shape_cast %30 : vector<8x128xf32> to vector<1x8x128xf32>
    tpu.vector_store %arg12[%c0_12, %c0_13, %c0_14], %33 {strides = array<i32>} : memref<8x8x128xf32, #tpu.memory_space<vmem>>, vector<1x8x128xf32>,
    %34 = vector.extract_strided_slice %22 {offsets = [1, 0, 0], sizes = [1, 8, 128], strides = [1, 1, 1]} : vector<8x8x128xf32> to vector<1x8x128xf32>
    %35 = vector.shape_cast %34 : vector<1x8x128xf32> to vector<8x128xf32>
    %36 = arith.mulf %35, %30 : vector<8x128xf32>
    %37 = vector.extract_strided_slice %23 {offsets = [1, 0, 0], sizes = [1, 8, 128], strides = [1, 1, 1]} : vector<8x8x128xf32> to vector<1x8x128xf32>
    %38 = vector.shape_cast %37 : vector<1x8x128xf32> to vector<8x128xf32>
    %39 = arith.addf %36, %38 : vector<8x128xf32>
    %c1 = arith.constant 1 : index
    %c0_15 = arith.constant 0 : index
    %c0_16 = arith.constant 0 : index
    %40 = vector.load %arg12[%c1, %c0_15, %c0_16] : memref<8x8x128xf32, #tpu.memory_space<vmem>>, vector<1x8x128xf32>
    %41 = vector.shape_cast %40 : vector<1x8x128xf32> to vector<8x128xf32>
    %42 = vector.shape_cast %39 : vector<8x128xf32> to vector<1x8x128xf32>
    tpu.vector_store %arg12[%c1, %c0_15, %c0_16], %42 {strides = array<i32>} : memref<8x8x128xf32, #tpu.memory_space<vmem>>, vector<1x8x128xf32>,
    %43 = vector.extract_strided_slice %22 {offsets = [2, 0, 0], sizes = [1, 8, 128], strides = [1, 1, 1]} : vector<8x8x128xf32> to vector<1x8x128xf32>
    %44 = vector.shape_cast %43 : vector<1x8x128xf32> to vector<8x128xf32>
    %45 = arith.mulf %44, %39 : vector<8x128xf32>
    %46 = vector.extract_strided_slice %23 {offsets = [2, 0, 0], sizes = [1, 8, 128], strides = [1, 1, 1]} : vector<8x8x128xf32> to vector<1x8x128xf32>
    %47 = vector.shape_cast %46 : vector<1x8x128xf32> to vector<8x128xf32>
    %48 = arith.addf %45, %47 : vector<8x128xf32>
    %c2 = arith.constant 2 : index
    %c0_17 = arith.constant 0 : index
    %c0_18 = arith.constant 0 : index
    %49 = vector.load %arg12[%c2, %c0_17, %c0_18] : memref<8x8x128xf32, #tpu.memory_space<vmem>>, vector<1x8x128xf32>
    %50 = vector.shape_cast %49 : vector<1x8x128xf32> to vector<8x128xf32>
    %51 = vector.shape_cast %48 : vector<8x128xf32> to vector<1x8x128xf32>
    tpu.vector_store %arg12[%c2, %c0_17, %c0_18], %51 {strides = array<i32>} : memref<8x8x128xf32, #tpu.memory_space<vmem>>, vector<1x8x128xf32>,
    %52 = vector.extract_strided_slice %22 {offsets = [3, 0, 0], sizes = [1, 8, 128], strides = [1, 1, 1]} : vector<8x8x128xf32> to vector<1x8x128xf32>
    %53 = vector.shape_cast %52 : vector<1x8x128xf32> to vector<8x128xf32>
    %54 = arith.mulf %53, %48 : vector<8x128xf32>
    %55 = vector.extract_strided_slice %23 {offsets = [3, 0, 0], sizes = [1, 8, 128], strides = [1, 1, 1]} : vector<8x8x128xf32> to vector<1x8x128xf32>
    %56 = vector.shape_cast %55 : vector<1x8x128xf32> to vector<8x128xf32>
    %57 = arith.addf %54, %56 : vector<8x128xf32>
    %c3 = arith.constant 3 : index
    %c0_19 = arith.constant 0 : index
    %c0_20 = arith.constant 0 : index
    %58 = vector.load %arg12[%c3, %c0_19, %c0_20] : memref<8x8x128xf32, #tpu.memory_space<vmem>>, vector<1x8x128xf32>
    %59 = vector.shape_cast %58 : vector<1x8x128xf32> to vector<8x128xf32>
    %60 = vector.shape_cast %57 : vector<8x128xf32> to vector<1x8x128xf32>
    tpu.vector_store %arg12[%c3, %c0_19, %c0_20], %60 {strides = array<i32>} : memref<8x8x128xf32, #tpu.memory_space<vmem>>, vector<1x8x128xf32>,
    %61 = vector.extract_strided_slice %22 {offsets = [4, 0, 0], sizes = [1, 8, 128], strides = [1, 1, 1]} : vector<8x8x128xf32> to vector<1x8x128xf32>
    %62 = vector.shape_cast %61 : vector<1x8x128xf32> to vector<8x128xf32>
    %63 = arith.mulf %62, %57 : vector<8x128xf32>
    %64 = vector.extract_strided_slice %23 {offsets = [4, 0, 0], sizes = [1, 8, 128], strides = [1, 1, 1]} : vector<8x8x128xf32> to vector<1x8x128xf32>
    %65 = vector.shape_cast %64 : vector<1x8x128xf32> to vector<8x128xf32>
    %66 = arith.addf %63, %65 : vector<8x128xf32>
    %c4 = arith.constant 4 : index
    %c0_21 = arith.constant 0 : index
    %c0_22 = arith.constant 0 : index
    %67 = vector.load %arg12[%c4, %c0_21, %c0_22] : memref<8x8x128xf32, #tpu.memory_space<vmem>>, vector<1x8x128xf32>
    %68 = vector.shape_cast %67 : vector<1x8x128xf32> to vector<8x128xf32>
    %69 = vector.shape_cast %66 : vector<8x128xf32> to vector<1x8x128xf32>
    tpu.vector_store %arg12[%c4, %c0_21, %c0_22], %69 {strides = array<i32>} : memref<8x8x128xf32, #tpu.memory_space<vmem>>, vector<1x8x128xf32>,
    %70 = vector.extract_strided_slice %22 {offsets = [5, 0, 0], sizes = [1, 8, 128], strides = [1, 1, 1]} : vector<8x8x128xf32> to vector<1x8x128xf32>
    %71 = vector.shape_cast %70 : vector<1x8x128xf32> to vector<8x128xf32>
    %72 = arith.mulf %71, %66 : vector<8x128xf32>
    %73 = vector.extract_strided_slice %23 {offsets = [5, 0, 0], sizes = [1, 8, 128], strides = [1, 1, 1]} : vector<8x8x128xf32> to vector<1x8x128xf32>
    %74 = vector.shape_cast %73 : vector<1x8x128xf32> to vector<8x128xf32>
    %75 = arith.addf %72, %74 : vector<8x128xf32>
    %c5 = arith.constant 5 : index
    %c0_23 = arith.constant 0 : index
    %c0_24 = arith.constant 0 : index
    %76 = vector.load %arg12[%c5, %c0_23, %c0_24] : memref<8x8x128xf32, #tpu.memory_space<vmem>>, vector<1x8x128xf32>
    %77 = vector.shape_cast %76 : vector<1x8x128xf32> to vector<8x128xf32>
    %78 = vector.shape_cast %75 : vector<8x128xf32> to vector<1x8x128xf32>
    tpu.vector_store %arg12[%c5, %c0_23, %c0_24], %78 {strides = array<i32>} : memref<8x8x128xf32, #tpu.memory_space<vmem>>, vector<1x8x128xf32>,
    %79 = vector.extract_strided_slice %22 {offsets = [6, 0, 0], sizes = [1, 8, 128], strides = [1, 1, 1]} : vector<8x8x128xf32> to vector<1x8x128xf32>
    %80 = vector.shape_cast %79 : vector<1x8x128xf32> to vector<8x128xf32>
    %81 = arith.mulf %80, %75 : vector<8x128xf32>
    %82 = vector.extract_strided_slice %23 {offsets = [6, 0, 0], sizes = [1, 8, 128], strides = [1, 1, 1]} : vector<8x8x128xf32> to vector<1x8x128xf32>
    %83 = vector.shape_cast %82 : vector<1x8x128xf32> to vector<8x128xf32>
    %84 = arith.addf %81, %83 : vector<8x128xf32>
    %c6 = arith.constant 6 : index
    %c0_25 = arith.constant 0 : index
    %c0_26 = arith.constant 0 : index
    %85 = vector.load %arg12[%c6, %c0_25, %c0_26] : memref<8x8x128xf32, #tpu.memory_space<vmem>>, vector<1x8x128xf32>
    %86 = vector.shape_cast %85 : vector<1x8x128xf32> to vector<8x128xf32>
    %87 = vector.shape_cast %84 : vector<8x128xf32> to vector<1x8x128xf32>
    tpu.vector_store %arg12[%c6, %c0_25, %c0_26], %87 {strides = array<i32>} : memref<8x8x128xf32, #tpu.memory_space<vmem>>, vector<1x8x128xf32>,
    %88 = vector.extract_strided_slice %22 {offsets = [7, 0, 0], sizes = [1, 8, 128], strides = [1, 1, 1]} : vector<8x8x128xf32> to vector<1x8x128xf32>
    %89 = vector.shape_cast %88 : vector<1x8x128xf32> to vector<8x128xf32>
    %90 = arith.mulf %89, %84 : vector<8x128xf32>
    %91 = vector.extract_strided_slice %23 {offsets = [7, 0, 0], sizes = [1, 8, 128], strides = [1, 1, 1]} : vector<8x8x128xf32> to vector<1x8x128xf32>
    %92 = vector.shape_cast %91 : vector<1x8x128xf32> to vector<8x128xf32>
    %93 = arith.addf %90, %92 : vector<8x128xf32>
    %c7 = arith.constant 7 : index
    %c0_27 = arith.constant 0 : index
    %c0_28 = arith.constant 0 : index
    %94 = vector.load %arg12[%c7, %c0_27, %c0_28] : memref<8x8x128xf32, #tpu.memory_space<vmem>>, vector<1x8x128xf32>
    %95 = vector.shape_cast %94 : vector<1x8x128xf32> to vector<8x128xf32>
    %96 = vector.shape_cast %93 : vector<8x128xf32> to vector<1x8x128xf32>
    tpu.vector_store %arg12[%c7, %c0_27, %c0_28], %96 {strides = array<i32>} : memref<8x8x128xf32, #tpu.memory_space<vmem>>, vector<1x8x128xf32>,
    %c0_29 = arith.constant 0 : index
    %c0_30 = arith.constant 0 : index
    %97 = vector.load %arg11[%c0_29, %c0_30] : memref<8x128xf32, #tpu.memory_space<vmem>>, vector<8x128xf32>
    tpu.vector_store %arg11[%c0_29, %c0_30], %93 {strides = array<i32>} : memref<8x128xf32, #tpu.memory_space<vmem>>, vector<8x128xf32>,
    %c0_31 = arith.constant 0 : index
    %c0_32 = arith.constant 0 : index
    %c0_33 = arith.constant 0 : index
    %98 = vector.load %arg12[%c0_31, %c0_32, %c0_33] : memref<8x8x128xf32, #tpu.memory_space<vmem>>, vector<8x8x128xf32>
    %99 = vector.shape_cast %98 : vector<8x8x128xf32> to vector<64x128xf32>
    %100 = arith.truncf %99 : vector<64x128xf32> to vector<64x128xbf16>
    %c0_34 = arith.constant 0 : index
    %c0_35 = arith.constant 0 : index
    %101 = vector.load %arg6[%c0_34, %c0_35] : memref<128x128xbf16, #tpu.memory_space<vmem>>, vector<128x128xbf16>
    %cst_36 = arith.constant dense<0.000000e+00> : vector<64x128xf32>
    %102 = tpu.matmul %100, %101, %cst_36 {dimension_numbers = #tpu.dot_dimension_numbers<[1], [0], [0], [1], [0, 0, 1, 1], [], []>} : vector<64x128xbf16>, vector<128x128xbf16>, vector<64x128xf32> -> vector<64x128xf32>
    %c0_37 = arith.constant 0 : index
    %c0_38 = arith.constant 0 : index
    %103 = vector.load %arg7[%c0_37, %c0_38] : memref<1x128xf32, #tpu.memory_space<vmem>>, vector<1x128xf32>
    %104 = vector.broadcast %103 : vector<1x128xf32> to vector<64x128xf32>
    %105 = arith.addf %102, %104 : vector<64x128xf32>
    %106 = arith.addf %105, %4 : vector<64x128xf32>
    %107 = arith.truncf %106 : vector<64x128xf32> to vector<64x128xbf16>
    %c0_39 = arith.constant 0 : index
    %c0_40 = arith.constant 0 : index
    %108 = vector.load %arg8[%c0_39, %c0_40] : memref<128x128xbf16, #tpu.memory_space<vmem>>, vector<128x128xbf16>
    %cst_41 = arith.constant dense<0.000000e+00> : vector<64x128xf32>
    %109 = tpu.matmul %107, %108, %cst_41 {dimension_numbers = #tpu.dot_dimension_numbers<[1], [0], [0], [1], [0, 0, 1, 1], [], []>} : vector<64x128xbf16>, vector<128x128xbf16>, vector<64x128xf32> -> vector<64x128xf32>
    %c0_42 = arith.constant 0 : index
    %c0_43 = arith.constant 0 : index
    %110 = vector.load %arg9[%c0_42, %c0_43] : memref<1x128xf32, #tpu.memory_space<vmem>>, vector<1x128xf32>
    %111 = vector.broadcast %110 : vector<1x128xf32> to vector<64x128xf32>
    %112 = arith.addf %109, %111 : vector<64x128xf32>
    %113 = vector.shape_cast %112 : vector<64x128xf32> to vector<8x8x128xf32>
    %c0_44 = arith.constant 0 : index
    %c0_45 = arith.constant 0 : index
    %c0_46 = arith.constant 0 : index
    %114 = vector.load %arg10[%c0_44, %c0_45, %c0_46] : memref<8x8x128xf32, #tpu.memory_space<vmem>>, vector<8x8x128xf32>
    tpu.vector_store %arg10[%c0_44, %c0_45, %c0_46], %113 {strides = array<i32>} : memref<8x8x128xf32, #tpu.memory_space<vmem>>, vector<8x8x128xf32>,
    return
  }
  func.func @transform_0(%arg0: i32, %arg1: i32) -> (i32, i32, i32) {
    %c0_i32 = arith.constant 0 : i32
    %c0_i32_0 = arith.constant 0 : i32
    return %arg1, %arg0, %c0_i32 : i32, i32, i32
  }
  func.func @transform_1(%arg0: i32, %arg1: i32) -> (i32, i32) {
    %c0_i32 = arith.constant 0 : i32
    %c0_i32_0 = arith.constant 0 : i32
    %c0_i32_1 = arith.constant 0 : i32
    return %c0_i32, %c0_i32_0 : i32, i32
  }
  func.func @transform_2(%arg0: i32, %arg1: i32) -> (i32, i32) {
    %c0_i32 = arith.constant 0 : i32
    %c0_i32_0 = arith.constant 0 : i32
    %c0_i32_1 = arith.constant 0 : i32
    return %c0_i32, %c0_i32_0 : i32, i32
  }
  func.func @transform_3(%arg0: i32, %arg1: i32) -> (i32, i32) {
    %c0_i32 = arith.constant 0 : i32
    %c0_i32_0 = arith.constant 0 : i32
    %c0_i32_1 = arith.constant 0 : i32
    return %c0_i32, %c0_i32_0 : i32, i32
  }
  func.func @transform_4(%arg0: i32, %arg1: i32) -> (i32, i32) {
    %c0_i32 = arith.constant 0 : i32
    %c0_i32_0 = arith.constant 0 : i32
    %c0_i32_1 = arith.constant 0 : i32
    return %c0_i32, %c0_i32_0 : i32, i32
  }
  func.func @transform_5(%arg0: i32, %arg1: i32) -> (i32, i32) {
    %c0_i32 = arith.constant 0 : i32
    %c0_i32_0 = arith.constant 0 : i32
    %c0_i32_1 = arith.constant 0 : i32
    return %c0_i32, %c0_i32_0 : i32, i32
  }
  func.func @transform_6(%arg0: i32, %arg1: i32) -> (i32, i32) {
    %c0_i32 = arith.constant 0 : i32
    %c0_i32_0 = arith.constant 0 : i32
    %c0_i32_1 = arith.constant 0 : i32
    return %c0_i32, %c0_i32_0 : i32, i32
  }
  func.func @transform_7(%arg0: i32, %arg1: i32) -> (i32, i32) {
    %c0_i32 = arith.constant 0 : i32
    %c0_i32_0 = arith.constant 0 : i32
    %c0_i32_1 = arith.constant 0 : i32
    return %c0_i32, %c0_i32_0 : i32, i32
  }
  func.func @transform_8(%arg0: i32, %arg1: i32) -> (i32, i32, i32) {
    %c0_i32 = arith.constant 0 : i32
    %c0_i32_0 = arith.constant 0 : i32
    return %arg1, %arg0, %c0_i32 : i32, i32, i32
  }
}

</mosaic_0001>

<bundles_post_ra>
// kernel: state_space_layer.1
= control target key start
LH: loop header
LB: loop body
LE: loop exit
PB: predicated region body
PF: predicated region fallthrough
CT: control target
= control target key end

     0   :  { %13 = vsyncpa [#allocation5], 0  ;;  %s1388_s0 = inlined_call_operand.vmem [shape: f32[8,8,128], index: 0, kind: input, shape index: {}]   ;;  %s1389_s1 = inlined_call_operand.vmem [shape: bf16[128,256], index: 1, kind: input, shape index: {}]   ;;  %s1390_s2 = inlined_call_operand.vmem [shape: f32[1,256], index: 2, kind: input, shape index: {}]   ;;  %s1391_s3 = inlined_call_operand.hbm [shape: f32[1,128], index: 3, kind: input, shape index: {}]   ;;  %s1392_s4 = inlined_call_operand.hbm [shape: bf16[128,128], index: 4, kind: input, shape index: {}]   ;;  %s1393_s5 = inlined_call_operand.hbm [shape: f32[1,128], index: 5, kind: input, shape index: {}]   ;;  %s1394_s6 = inlined_call_operand.hbm [shape: bf16[128,128], index: 6, kind: input, shape index: {}]   ;;  %s1395_s7 = inlined_call_operand.hbm [shape: f32[1,128], index: 7, kind: input, shape index: {}]   ;;  %s1396_s8 = inlined_call_operand.vmem [shape: f32[8,8,128], index: 8, kind: output, shape index: {}]  }
   0x1   :  { %14 = vsyncpa [#allocation7], 0 }
   0x2   :  { %15 = vsyncpa [#allocation10], 0  ;;  %s1056_s27 = smov [#allocation6]   ;;  %s940_s9 = scalar_lea.hbm %s1392_s4, 1024 }
   0x3   :  { %s37_s28 = sshll.u32 %s1056_s27, 4  ;;  %p941_p0 = scmp.ne.s32.totalorder %s1392_s4, %s940_s9  ;;  %s38_s28 = int_to_ptr.vmem [resolvable:$true] %s37_s28 }
   0x4   :  { %p944_p1 = scmp.lt.u32.totalorder %s940_s9, %s1392_s4 }
   0x6   :  { %p946_p2 = pnand %p944_p1, %p941_p0 }
   0x8   :  { %949 = shalt.err (!%p946_p2)
}
   0x9   :  { %s950_s14 = scalar_lea.vmem %s38_s28, 1024  ;;  %p955_p4 = scmp.lt.s32.totalorder %s38_s28, %s38_s28 }
   0xa   :  { %p951_p3 = scmp.ne.s32.totalorder %s38_s28, %s950_s14  ;;  %p956_p5 = scmp.lt.s32.totalorder %s950_s14, %s950_s14 }
   0xc   :  { %p957_p6 = por %p956_p5, %p955_p4 }
   0xe   :  { %p958_p7 = pnand %p957_p6, %p951_p3 }
  0x10   :  { %961 = shalt.err (!%p958_p7)
}
  0x11   :  { %s1057_s15 = smov 64   ;;  %s1058_s16 = smov 4  }
  0x12   :  { %43 = dma.hbm_to_vmem [thread:$0]  %s1392_s4, 1024, %s38_s28, [#allocation7], %s1057_s15, %s1057_s15, %s1058_s16  }
  0x13   :  { %s1059_s19 = smov [#allocation9]   ;;  %s1060_s21 = smov [#allocation4]  }
  0x14   :  { %s59_s20 = sshll.u32 %s1059_s19, 4  ;;  %s28_s22 = sshll.u32 %s1060_s21, 4  ;;  %s60_s20 = int_to_ptr.vmem [resolvable:$true] %s59_s20  ;;  %s29_s22 = int_to_ptr.vmem [resolvable:$true] %s28_s22 }
  0x15   :  { %s962_s25 = scalar_lea.hbm %s1394_s6, 1024 }
  0x16   :  { %p963_p8 = scmp.ne.s32.totalorder %s1394_s6, %s962_s25  ;;  %p966_p9 = scmp.lt.u32.totalorder %s962_s25, %s1394_s6 }
  0x18   :  { %p968_p10 = pnand %p966_p9, %p963_p8 }
  0x1a   :  { %971 = shalt.err (!%p968_p10)
}
  0x1b   :  { %s972_s4 = scalar_lea.vmem %s60_s20, 1024  ;;  %p977_p12 = scmp.lt.s32.totalorder %s60_s20, %s60_s20 }
  0x1c   :  { %p973_p11 = scmp.ne.s32.totalorder %s60_s20, %s972_s4  ;;  %p978_p13 = scmp.lt.s32.totalorder %s972_s4, %s972_s4 }
  0x1e   :  { %p979_p0 = por %p978_p13, %p977_p12 }
  0x20   :  { %p980_p1 = pnand %p979_p0, %p973_p11 }
  0x22   :  { %983 = shalt.err (!%p980_p1)
}
  0x23   :  { %65 = dma.hbm_to_vmem [thread:$0]  %s1394_s6, 1024, %s60_s20, [#allocation10], %s1057_s15, %s1057_s15, %s1058_s16  }
  0x24   :  { %s984_s12 = scalar_lea.hbm %s1391_s3, 16 }
  0x25   :  { %p985_p2 = scmp.ne.s32.totalorder %s1391_s3, %s984_s12  ;;  %p988_p3 = scmp.lt.u32.totalorder %s984_s12, %s1391_s3 }
  0x27   :  { %p990_p4 = pnand %p988_p3, %p985_p2 }
  0x29   :  { %993 = shalt.err (!%p990_p4)
}
  0x2a   :  { %s994_s19 = scalar_lea.vmem %s29_s22, 16  ;;  %s998_s21 = scalar_lea.vmem %s29_s22, 32 }
  0x2b   :  { %p995_p5 = scmp.ne.s32.totalorder %s29_s22, %s994_s19  ;;  %p999_p6 = scmp.lt.s32.totalorder %s29_s22, %s29_s22 }
  0x2c   :  { %p1000_p7 = scmp.lt.s32.totalorder %s998_s21, %s994_s19 }
  0x2e   :  { %p1001_p8 = por %p1000_p7, %p999_p6 }
  0x30   :  { %p1002_p9 = pnand %p1001_p8, %p995_p5 }
  0x32   :  { %1005 = shalt.err (!%p1002_p9)
}
  0x33   :  { %31 = dma.hbm_to_vmem [thread:$0]  %s1391_s3, 16, %s29_s22, [#allocation5]  }
  0x34   :  { %s1061_s16 = smov [#allocation8]   ;;  %s1062_s23 = smov [#allocation11]  }
  0x35   :  { %s50_s20 = sshll.u32 %s1061_s16, 4  ;;  %s72_s24 = sshll.u32 %s1062_s23, 4  ;;  %s51_s20 = int_to_ptr.vmem [resolvable:$true] %s50_s20  ;;  %s73_s24 = int_to_ptr.vmem [resolvable:$true] %s72_s24 }
  0x36   :  { %s1006_s27 = scalar_lea.hbm %s1393_s5, 16 }
  0x37   :  { %p1007_p10 = scmp.ne.s32.totalorder %s1393_s5, %s1006_s27  ;;  %p1010_p11 = scmp.lt.u32.totalorder %s1006_s27, %s1393_s5 }
  0x39   :  { %p1012_p12 = pnand %p1010_p11, %p1007_p10 }
  0x3b   :  { %1015 = shalt.err (!%p1012_p12)
}
  0x3c   :  { %s1016_s3 = scalar_lea.vmem %s51_s20, 16  ;;  %s1020_s22 = scalar_lea.vmem %s51_s20, 32 }
  0x3d   :  { %p1017_p13 = scmp.ne.s32.totalorder %s51_s20, %s1016_s3  ;;  %p1021_p0 = scmp.lt.s32.totalorder %s51_s20, %s51_s20 }
  0x3e   :  { %p1022_p1 = scmp.lt.s32.totalorder %s1020_s22, %s1016_s3 }
  0x40   :  { %p1023_p2 = por %p1022_p1, %p1021_p0 }
  0x42   :  { %p1024_p3 = pnand %p1023_p2, %p1017_p13 }
  0x44   :  { %1027 = shalt.err (!%p1024_p3)
}
  0x45   :  { %53 = dma.hbm_to_vmem [thread:$0]  %s1393_s5, 16, %s51_s20, [#allocation7]  }
  0x46   :  { %s1028_s13 = scalar_lea.hbm %s1395_s7, 16 }
  0x47   :  { %p1029_p4 = scmp.ne.s32.totalorder %s1395_s7, %s1028_s13  ;;  %p1032_p5 = scmp.lt.u32.totalorder %s1028_s13, %s1395_s7 }
  0x49   :  { %p1034_p6 = pnand %p1032_p5, %p1029_p4 }
  0x4b   :  { %1037 = shalt.err (!%p1034_p6)
}
  0x4c   :  { %s1038_s21 = scalar_lea.vmem %s73_s24, 16  ;;  %s1042_s6 = scalar_lea.vmem %s73_s24, 32 }
  0x4d   :  { %p1039_p7 = scmp.ne.s32.totalorder %s73_s24, %s1038_s21  ;;  %p1043_p8 = scmp.lt.s32.totalorder %s73_s24, %s73_s24 }
  0x4e   :  { %p1044_p9 = scmp.lt.s32.totalorder %s1042_s6, %s1038_s21 }
  0x50   :  { %p1045_p10 = por %p1044_p9, %p1043_p8 }
  0x52   :  { %p1046_p11 = pnand %p1045_p10, %p1039_p7 }
  0x54   :  { %1049 = shalt.err (!%p1046_p11)
}
  0x55   :  { %75 = dma.hbm_to_vmem [thread:$0]  %s1395_s7, 16, %s73_s24, [#allocation10]  }
  0x56   :  { %1050 = dma.done.wait [#allocation5], 16  }
  0x57   :  { %1051 = vsyncadd [#allocation5], 4294967280 }
  0x58   :  { %1052 = dma.done.wait [#allocation7], 1040  }
  0x59   :  { %1053 = vsyncadd [#allocation7], 4294966256 }
  0x5a   :  { %1054 = dma.done.wait [#allocation10], 1040  }
  0x5b   :  { %1055 = vsyncadd [#allocation10], 4294966256  ;;  %v1063_v0 = vmov 0   ;;  %v852_v1 = vld [vmem:[%s1389_s1 + $0x4] ss:$8 sps:$4 sm:$0xff]   ;;  %v1232_v20 = vld [vmem:[%s1388_s0 + $0x10] sm:$0xff]  ;;  %v127_v43 = vlaneseq }
  0x5c   :  { %249 = vmatprep.mubr.bf16.mxu0 %v1063_v0  ;;  %v854_v2 = vld [vmem:[%s1389_s1] ss:$8 sps:$4 sm:$0xff]   ;;  %217 = vmatprep.subr.bf16.mxu0 %v852_v1  ;;  %v855_v3 = vld [vmem:[%s1389_s1 + $0x14] ss:$8 sps:$4 sm:$0xff]   ;;  %v857_v4 = vld [vmem:[%s1389_s1 + $0x10] ss:$8 sps:$4 sm:$0xff]  }
  0x5d   :  { %218 = vmatpush1.bf16.msra.mxu0 %v854_v2  ;;  %v858_v5 = vld [vmem:[%s1389_s1 + $0x24] ss:$8 sps:$4 sm:$0xff]   ;;  %v860_v6 = vld [vmem:[%s1389_s1 + $0x20] ss:$8 sps:$4 sm:$0xff]   ;;  %v861_v7 = vld [vmem:[%s1389_s1 + $0x34] ss:$8 sps:$4 sm:$0xff]  }
  0x5e   :  { %219 = vmatprep.subr.bf16.mxu0 %v855_v3  ;;  %v863_v8 = vld [vmem:[%s1389_s1 + $0x30] ss:$8 sps:$4 sm:$0xff]   ;;  %v864_v9 = vld [vmem:[%s1389_s1 + $0x44] ss:$8 sps:$4 sm:$0xff]   ;;  %v866_v10 = vld [vmem:[%s1389_s1 + $0x40] ss:$8 sps:$4 sm:$0xff]  }
  0x5f   :  { %v867_v11 = vld [vmem:[%s1389_s1 + $0x54] ss:$8 sps:$4 sm:$0xff]   ;;  %v869_v12 = vld [vmem:[%s1389_s1 + $0x50] ss:$8 sps:$4 sm:$0xff]   ;;  %v870_v13 = vld [vmem:[%s1389_s1 + $0x64] ss:$8 sps:$4 sm:$0xff]  }
  0x60   :  { %v872_v14 = vld [vmem:[%s1389_s1 + $0x60] ss:$8 sps:$4 sm:$0xff]   ;;  %v873_v15 = vld [vmem:[%s1389_s1 + $0x74] ss:$8 sps:$4 sm:$0xff]   ;;  %v875_v16 = vld [vmem:[%s1389_s1 + $0x70] ss:$8 sps:$4 sm:$0xff]  }
  0x61   :  { %220 = vmatpush1.bf16.msra.mxu0 %v857_v4  ;;  %v1220_v17 = vld [vmem:[%s1388_s0] sm:$0xff]  ;;  %v1225_v18 = vld [vmem:[%s1388_s0 + $0x8] sm:$0xff]  ;;  %v1237_v21 = vld [vmem:[%s1388_s0 + $0x18] sm:$0xff]  ;;  %v1290_v44 = vshrl.u32 %v127_v43, 7 }
  0x62   :  { %221 = vmatprep.subr.bf16.mxu0 %v858_v5  ;;  %v105_v19 = vpack.c.bf16 %v1225_v18, %v1220_v17  ;;  %v106_v22 = vpack.c.bf16 %v1237_v21, %v1232_v20  ;;  %v1244_v23 = vld [vmem:[%s1388_s0 + $0x20] sm:$0xff]  ;;  %v1249_v24 = vld [vmem:[%s1388_s0 + $0x28] sm:$0xff]  ;;  %v1256_v26 = vld [vmem:[%s1388_s0 + $0x30] sm:$0xff] }
  0x63   :  { %v107_v25 = vpack.c.bf16 %v1249_v24, %v1244_v23  ;;  %v1261_v27 = vld [vmem:[%s1388_s0 + $0x38] sm:$0xff]  ;;  %v876_v29 = vld [vmem:[#allocation6] sm:$0xff]   ;;  %v877_v30 = vld [vmem:[#allocation6 + $0x8] sm:$0xff]   ;;  %v129_v45 = vsub.s32 0, %v1290_v44 }
  0x64   :  { %v108_v28 = vpack.c.bf16 %v1261_v27, %v1256_v26  ;;  %780 = vmatprep.subr.bf16.mxu1 %v876_v29  ;;  %v878_v31 = vld [vmem:[#allocation6 + $0x10] sm:$0xff]   ;;  %v879_v32 = vld [vmem:[#allocation6 + $0x18] sm:$0xff]   ;;  %v880_v33 = vld [vmem:[#allocation6 + $0x20] sm:$0xff]  }
  0x65   :  { %222 = vmatpush1.bf16.msra.mxu0 %v860_v6  ;;  %781 = vmatpush3.bf16.msra.mxu1 %v876_v29  ;;  %v881_v34 = vld [vmem:[#allocation6 + $0x28] sm:$0xff]   ;;  %v882_v35 = vld [vmem:[#allocation6 + $0x30] sm:$0xff]   ;;  %v883_v36 = vld [vmem:[#allocation6 + $0x38] sm:$0xff]  }
  0x66   :  { %223 = vmatprep.subr.bf16.mxu0 %v861_v7  ;;  %782 = vmatprep.subr.bf16.mxu1 %v877_v30  ;;  %v1265_v37 = vld [vmem:[#allocation9] sm:$0xff]   ;;  %v1267_v38 = vld [vmem:[#allocation9 + $0x8] sm:$0xff]   ;;  %v1273_v39 = vld [vmem:[#allocation9 + $0x10] sm:$0xff]  }
  0x67   :  { %v1277_v40 = vld [vmem:[#allocation9 + $0x18] sm:$0xff]   ;;  %v1281_v41 = vld [vmem:[#allocation9 + $0x20] sm:$0xff]   ;;  %v1285_v42 = vld [vmem:[#allocation9 + $0x28] sm:$0xff]  }
  0x68   :  { %v1296_v46 = vld [vmem:[%s1390_s2] sm:$0x3] }
  0x69   :  { %224 = vmatpush1.bf16.msra.mxu0 %v863_v8  ;;  %783 = vmatpush3.bf16.msra.mxu1 %v877_v30  ;;  %v130_v47 = vrot.slane %v1296_v46, %v129_v45 }
  0x6a   :  { %225 = vmatprep.subr.bf16.mxu0 %v864_v9  ;;  %784 = vmatprep.subr.bf16.mxu1 %v878_v31 }
  0x6d   :  { %226 = vmatpush1.bf16.msra.mxu0 %v866_v10  ;;  %785 = vmatpush3.bf16.msra.mxu1 %v878_v31 }
  0x6e   :  { %227 = vmatprep.subr.bf16.mxu0 %v867_v11  ;;  %786 = vmatprep.subr.bf16.mxu1 %v879_v32 }
  0x71   :  { %228 = vmatpush1.bf16.msra.mxu0 %v869_v12  ;;  %787 = vmatpush3.bf16.msra.mxu1 %v879_v32 }
  0x72   :  { %229 = vmatprep.subr.bf16.mxu0 %v870_v13  ;;  %788 = vmatprep.subr.bf16.mxu1 %v880_v33 }
  0x75   :  { %230 = vmatpush1.bf16.msra.mxu0 %v872_v14  ;;  %789 = vmatpush3.bf16.msra.mxu1 %v880_v33 }
  0x76   :  { %231 = vmatprep.subr.bf16.mxu0 %v873_v15  ;;  %790 = vmatprep.subr.bf16.mxu1 %v881_v34 }
  0x79   :  { %232 = vmatpush1.bf16.msra.mxu0 %v875_v16  ;;  %791 = vmatpush3.bf16.msra.mxu1 %v881_v34 }
  0x7a   :  { %792 = vmatprep.subr.bf16.mxu1 %v882_v35  ;;  %804 = vmatprep.subr.bf16.mxu0 %v1265_v37 }
  0x7c   :  { %250 = vmatmul.mubr.bf16.vlgmr.msra.gmra.mrb[0].mxu0 %v105_v19 }
  0x7d   :  { %259 = vmatprep.mubr.bf16.mxu0 %v1063_v0  ;;  %793 = vmatpush3.bf16.msra.mxu1 %v882_v35 }
  0x7e   :  { %794 = vmatprep.subr.bf16.mxu1 %v883_v36  ;;  %805 = vmatpush3.bf16.msra.mxu0 %v1265_v37 }
  0x7f   :  { %806 = vmatprep.subr.bf16.mxu0 %v1267_v38 }
  0x81   :  { %795 = vmatpush3.bf16.msra.mxu1 %v883_v36 }
  0x82   :  { %828 = vmatprep.subr.bf16.mxu1 %v1265_v37  ;;  %807 = vmatpush3.bf16.msra.mxu0 %v1267_v38 }
  0x83   :  { %808 = vmatprep.subr.bf16.mxu0 %v1273_v39 }
  0x84   :  { %260 = vmatmul.mubr.bf16.gmra.mrb[4].mxu0 %v106_v22  ;;  %v1313_v22 = vld [vmem:[#allocation4] ss:$0 sm:$0xff] }
  0x85   :  { %269 = vmatprep.mubr.bf16.mxu0 %v1063_v0 }
  0x86   :  { %809 = vmatpush3.bf16.msra.mxu0 %v1273_v39 }
  0x87   :  { %810 = vmatprep.subr.bf16.mxu0 %v1277_v40 }
  0x8a   :  { %811 = vmatpush3.bf16.msra.mxu0 %v1277_v40 }
  0x8b   :  { %812 = vmatprep.subr.bf16.mxu0 %v1281_v41 }
  0x8c   :  { %270 = vmatmul.mubr.bf16.gmra.mrb[8].mxu0 %v107_v25 }
  0x8d   :  { %279 = vmatprep.mubr.bf16.mxu0 %v1063_v0 }
  0x8e   :  { %813 = vmatpush3.bf16.msra.mxu0 %v1281_v41 }
  0x8f   :  { %814 = vmatprep.subr.bf16.mxu0 %v1285_v42 }
  0x92   :  { %815 = vmatpush3.bf16.msra.mxu0 %v1285_v42 }
  0x94   :  { %280 = vmatmul.mubr.bf16.gmra.mrb[12].mxu0 %v108_v28 }
 0x14f   :  { %v251_v48 = vpop.f32.mrb[0].mxu0 }
 0x150   :  { %v252_v49 = vadd.f32 %v251_v48, %v130_v47  ;;  %v1299_v50 = vpop.f32.mrb[1].mxu0 }
 0x151   :  { %v255_v51 = vpop.f32.mrb[2].mxu0 }
 0x152   :  { %v729_v52 = vmul.f32 -1.442695, %v252_v49  ;;  %v256_v53 = vadd.f32 %v255_v51, %v130_v47  ;;  %v1301_v54 = vpop.f32.mrb[3].mxu0 }
 0x154   :  { %892 = vpow2.f32 %v729_v52  ;;  %v730_v55 = vmul.f32 -1.442695, %v256_v53  ;;  %v133_v53 = vsub.s32 1, %v1290_v44 }
 0x156   :  { %894 = vpow2.f32 %v730_v55 }
 0x157   :  { %v261_v56 = vpop.f32.mrb[4].mxu0 }
 0x158   :  { %v262_v57 = vadd.f32 %v261_v56, %v130_v47  ;;  %v1303_v58 = vpop.f32.mrb[5].mxu0 }
 0x159   :  { %v265_v59 = vpop.f32.mrb[6].mxu0 }
 0x15a   :  { %v731_v60 = vmul.f32 -1.442695, %v262_v57  ;;  %v266_v61 = vadd.f32 %v265_v59, %v130_v47  ;;  %v1305_v62 = vpop.f32.mrb[7].mxu0 }
 0x15c   :  { %896 = vpow2.f32 %v731_v60  ;;  %v732_v63 = vmul.f32 -1.442695, %v266_v61  ;;  %v1323_v61 = vrot.slane %v1296_v46, %v133_v53 }
 0x15e   :  { %v893_v0 = vpop.eup %892  ;;  %898 = vpow2.f32 %v732_v63 }
 0x15f   :  { %v315_v1 = vadd.f32 1.0, %v893_v0  ;;  %v271_v2 = vpop.f32.mrb[8].mxu0 }
 0x160   :  { %v895_v3 = vpop.eup %894  ;;  %v272_v4 = vadd.f32 %v271_v2, %v130_v47  ;;  %v1307_v5 = vpop.f32.mrb[9].mxu0 }
 0x161   :  { %900 = vrcp.f32 %v315_v1  ;;  %v316_v6 = vadd.f32 1.0, %v895_v3  ;;  %v275_v7 = vpop.f32.mrb[10].mxu0 }
 0x162   :  { %v733_v8 = vmul.f32 -1.442695, %v272_v4  ;;  %v276_v9 = vadd.f32 %v275_v7, %v130_v47  ;;  %v1309_v10 = vpop.f32.mrb[11].mxu0  ;;  %v254_v4 = vadd.f32 %v1299_v50, %v1323_v61 }
 0x163   :  { %902 = vrcp.f32 %v316_v6 }
 0x164   :  { %904 = vpow2.f32 %v733_v8  ;;  %v734_v11 = vmul.f32 -1.442695, %v276_v9 }
 0x166   :  { %v897_v12 = vpop.eup %896  ;;  %906 = vpow2.f32 %v734_v11 }
 0x167   :  { %v317_v13 = vadd.f32 1.0, %v897_v12  ;;  %v281_v14 = vpop.f32.mrb[12].mxu0 }
 0x168   :  { %v899_v15 = vpop.eup %898  ;;  %v282_v16 = vadd.f32 %v281_v14, %v130_v47  ;;  %v1311_v19 = vpop.f32.mrb[13].mxu0 }
 0x169   :  { %908 = vrcp.f32 %v317_v13  ;;  %v318_v25 = vadd.f32 1.0, %v899_v15  ;;  %v285_v28 = vpop.f32.mrb[14].mxu0  ;;  %v258_v13 = vadd.f32 %v1301_v54, %v1323_v61 }
 0x16a   :  { %v735_v29 = vmul.f32 -1.442695, %v282_v16  ;;  %v286_v30 = vadd.f32 %v285_v28, %v130_v47  ;;  %v1315_v31 = vpop.f32.mrb[15].mxu0  ;;  %v264_v28 = vadd.f32 %v1303_v58, %v1323_v61 }
 0x16b   :  { %v901_v32 = vpop.eup %900  ;;  %910 = vrcp.f32 %v318_v25 }
 0x16c   :  { %912 = vpow2.f32 %v735_v29  ;;  %v736_v33 = vmul.f32 -1.442695, %v286_v30  ;;  %v345_v34 = vmul.f32 %v901_v32, %v1313_v22 }
 0x16d   :  { %v903_v35 = vpop.eup %902 }
 0x16e   :  { %v905_v36 = vpop.eup %904  ;;  %v346_v43 = vmul.f32 %v903_v35, %v1313_v22  ;;  %914 = vpow2.f32 %v736_v33  ;;  %v353_v45 = vmul.f32 1.442695, %v345_v34 }
 0x16f   :  { %v319_v48 = vadd.f32 1.0, %v905_v36 }
 0x170   :  { %v907_v49 = vpop.eup %906  ;;  %916 = vpow2.f32 %v353_v45  ;;  %v355_v51 = vmul.f32 1.442695, %v346_v43  ;;  %v268_v43 = vadd.f32 %v1305_v62, %v1323_v61 }
 0x171   :  { %918 = vrcp.f32 %v319_v48  ;;  %v320_v47 = vadd.f32 1.0, %v907_v49 }
 0x173   :  { %v909_v52 = vpop.eup %908  ;;  %920 = vrcp.f32 %v320_v47 }
 0x174   :  { %v347_v55 = vmul.f32 %v909_v52, %v1313_v22  ;;  %922 = vpow2.f32 %v355_v51  ;;  %v274_v51 = vadd.f32 %v1307_v5, %v1323_v61  ;;  %v284_v5 = vadd.f32 %v1311_v19, %v1323_v61  ;;  %v891_v19 = vld [vmem:[#allocation9 + $0x38] sm:$0xff]  }
 0x175   :  { %v911_v56 = vpop.eup %910 }
 0x176   :  { %v913_v57 = vpop.eup %912  ;;  %v348_v59 = vmul.f32 %v911_v56, %v1313_v22  ;;  %v357_v60 = vmul.f32 1.442695, %v347_v55 }
 0x177   :  { %v321_v63 = vadd.f32 1.0, %v913_v57 }
 0x178   :  { %v915_v0 = vpop.eup %914  ;;  %v359_v1 = vmul.f32 1.442695, %v348_v59  ;;  %924 = vpow2.f32 %v357_v60 }
 0x179   :  { %926 = vrcp.f32 %v321_v63  ;;  %v322_v2 = vadd.f32 1.0, %v915_v0 }
 0x17a   :  { %v917_v3 = vpop.eup %916 }
 0x17b   :  { %v919_v44 = vpop.eup %918  ;;  %928 = vrcp.f32 %v322_v2  ;;  %v370_v6 = vmul.f32 0.0, %v917_v3 }
 0x17c   :  { %930 = vpow2.f32 %v359_v1  ;;  %v349_v7 = vmul.f32 %v919_v44, %v1313_v22 }
 0x17d   :  { %v921_v8 = vpop.eup %920  ;;  %v371_v9 = vadd.f32 %v370_v6, %v254_v4 }
 0x17e   :  { %v923_v46 = vpop.eup %922  ;;  %v361_v11 = vmul.f32 1.442695, %v349_v7  ;;  %v350_v12 = vmul.f32 %v921_v8, %v1313_v22 }
 0x17f   :  { %v373_v14 = vmul.f32 %v923_v46, %v371_v9 }
 0x180   :  { %932 = vpow2.f32 %v361_v11  ;;  %v363_v15 = vmul.f32 1.442695, %v350_v12 }
 0x181   :  { %v374_v16 = vadd.f32 %v373_v14, %v258_v13 }
 0x182   :  { %v925_v25 = vpop.eup %924  ;;  %934 = vpow2.f32 %v363_v15 }
 0x183   :  { %v927_v50 = vpop.eup %926  ;;  %v377_v29 = vmul.f32 %v925_v25, %v374_v16  ;;  %v410_v30 = vpack.c.bf16 %v374_v16, %v371_v9 }
 0x184   :  { %v351_v32 = vmul.f32 %v927_v50, %v1313_v22 }
 0x185   :  { %v929_v33 = vpop.eup %928  ;;  %796 = vmatprep.mubr.bf16.mxu1 %v410_v30  ;;  %v378_v34 = vadd.f32 %v377_v29, %v264_v28 }
 0x186   :  { %v931_v35 = vpop.eup %930  ;;  %v365_v36 = vmul.f32 1.442695, %v351_v32  ;;  %v352_v54 = vmul.f32 %v929_v33, %v1313_v22  ;;  %v278_v22 = vadd.f32 %v1309_v10, %v1323_v61  ;;  %v288_v10 = vadd.f32 %v1315_v31, %v1323_v61  ;;  %v747_v32 = vld [vmem:[#allocation11] ss:$0 sm:$0xff] }
 0x187   :  { %v381_v45 = vmul.f32 %v931_v35, %v378_v34 }
 0x188   :  { %936 = vpow2.f32 %v365_v36  ;;  %v367_v48 = vmul.f32 1.442695, %v352_v54 }
 0x189   :  { %v382_v49 = vadd.f32 %v381_v45, %v268_v43 }
 0x18a   :  { %v933_v58 = vpop.eup %932  ;;  %938 = vpow2.f32 %v367_v48 }
 0x18b   :  { %v411_v47 = vpack.c.bf16 %v382_v49, %v378_v34  ;;  %v385_v52 = vmul.f32 %v933_v58, %v382_v49 }
 0x18c   :  { %v935_v55 = vpop.eup %934 }
 0x18d   :  { %797 = vmatmul.mubr.bf16.vlgmr.msra.gmra.mrb[0].mxu1 %v411_v47  ;;  %v386_v53 = vadd.f32 %v385_v52, %v274_v51 }
 0x18e   :  { %836 = vmatpush3.bf16.msra.mxu1 %v1265_v37 }
 0x18f   :  { %v389_v62 = vmul.f32 %v935_v55, %v386_v53  ;;  %829 = vmatprep.subr.bf16.mxu1 %v1267_v38 }
 0x191   :  { %v390_v56 = vadd.f32 %v389_v62, %v278_v22 }
 0x192   :  { %v937_v57 = vpop.eup %936  ;;  %837 = vmatpush3.bf16.msra.mxu1 %v1267_v38 }
 0x193   :  { %v412_v59 = vpack.c.bf16 %v390_v56, %v386_v53  ;;  %v393_v60 = vmul.f32 %v937_v57, %v390_v56  ;;  %830 = vmatprep.subr.bf16.mxu1 %v1273_v39 }
 0x194   :  { %v939_v37 = vpop.eup %938 }
 0x195   :  { %800 = vmatprep.mubr.bf16.mxu1 %v412_v59  ;;  %v394_v63 = vadd.f32 %v393_v60, %v284_v5 }
 0x196   :  { %838 = vmatpush3.bf16.msra.mxu1 %v1273_v39  ;;  %v890_v39 = vld [vmem:[#allocation9 + $0x30] sm:$0xff]  }
 0x197   :  { %v397_v0 = vmul.f32 %v939_v37, %v394_v63  ;;  %831 = vmatprep.subr.bf16.mxu1 %v1277_v40  ;;  %816 = vmatprep.subr.bf16.mxu0 %v890_v39 }
 0x198   :  { %817 = vmatpush3.bf16.msra.mxu0 %v890_v39 }
 0x199   :  { %v398_v1 = vadd.f32 %v397_v0, %v288_v10  ;;  %818 = vmatprep.subr.bf16.mxu0 %v891_v19 }
 0x19a   :  { %839 = vmatpush3.bf16.msra.mxu1 %v1277_v40  ;;  %v738_v40 = vld [vmem:[#allocation8] ss:$0 sm:$0xff] }
 0x19b   :  { %v413_v38 = vpack.c.bf16 %v398_v1, %v394_v63  ;;  %832 = vmatprep.subr.bf16.mxu1 %v1281_v41 }
 0x19c   :  { %819 = vmatpush3.bf16.msra.mxu0 %v891_v19 }
 0x19d   :  { %801 = vmatmul.mubr.bf16.gmra.mrb[4].mxu1 %v413_v38 }
 0x19e   :  { %840 = vmatpush3.bf16.msra.mxu1 %v1281_v41 }
 0x19f   :  { %833 = vmatprep.subr.bf16.mxu1 %v1285_v42 }
 0x1a2   :  { %841 = vmatpush3.bf16.msra.mxu1 %v1285_v42 }
 0x1a3   :  { %834 = vmatprep.subr.bf16.mxu1 %v890_v39 }
 0x1a6   :  { %842 = vmatpush3.bf16.msra.mxu1 %v890_v39 }
 0x1a7   :  { %835 = vmatprep.subr.bf16.mxu1 %v891_v19 }
 0x1aa   :  { %843 = vmatpush3.bf16.msra.mxu1 %v891_v19 }
 0x260   :  { %v798_v31 = vpop.f32.mrb[0].mxu1 }
 0x261   :  { %v528_v61 = vadd.f32 %v798_v31, %v738_v40  ;;  %v519_v2 = vpop.f32.mrb[1].mxu1 }
 0x262   :  { %v520_v3 = vadd.f32 %v738_v40, %v519_v2  ;;  %v799_v41 = vpop.f32.mrb[2].mxu1 }
 0x263   :  { %v531_v44 = vadd.f32 %v799_v41, %v738_v40  ;;  %v522_v4 = vpop.f32.mrb[3].mxu1  ;;  %v552_v42 = vadd.f32 %v528_v61, %v1232_v20 }
 0x264   :  { %v523_v6 = vadd.f32 %v738_v40, %v522_v4  ;;  %v550_v8 = vadd.f32 %v520_v3, %v1220_v17 }
 0x265   :  { %v553_v7 = vadd.f32 %v531_v44, %v1237_v21 }
 0x266   :  { %v551_v9 = vadd.f32 %v523_v6, %v1225_v18 }
 0x267   :  { %v559_v46 = vpack.c.bf16 %v553_v7, %v552_v42 }
 0x268   :  { %v558_v11 = vpack.c.bf16 %v551_v9, %v550_v8 }
 0x26a   :  { %820 = vmatprep.mubr.bf16.mxu0 %v558_v11 }
 0x26b   :  { %821 = vmatmul.mubr.bf16.vlgmr.msra.gmra.mrb[16].mxu0 %v559_v46 }
 0x270   :  { %v802_v12 = vpop.f32.mrb[4].mxu1 }
 0x271   :  { %v544_v13 = vadd.f32 %v802_v12, %v738_v40  ;;  %v535_v14 = vpop.f32.mrb[5].mxu1 }
 0x272   :  { %v536_v15 = vadd.f32 %v738_v40, %v535_v14  ;;  %v803_v16 = vpop.f32.mrb[6].mxu1 }
 0x273   :  { %v547_v25 = vadd.f32 %v803_v16, %v738_v40  ;;  %v538_v50 = vpop.f32.mrb[7].mxu1  ;;  %v556_v20 = vadd.f32 %v544_v13, %v1256_v26 }
 0x274   :  { %v539_v28 = vadd.f32 %v738_v40, %v538_v50  ;;  %v554_v17 = vadd.f32 %v536_v15, %v1244_v23 }
 0x275   :  { %v557_v21 = vadd.f32 %v547_v25, %v1261_v27 }
 0x276   :  { %v555_v18 = vadd.f32 %v539_v28, %v1249_v24 }
 0x277   :  { %v561_v29 = vpack.c.bf16 %v557_v21, %v556_v20 }
 0x278   :  { %v560_v30 = vpack.c.bf16 %v555_v18, %v554_v17 }
 0x27a   :  { %824 = vmatprep.mubr.bf16.mxu1 %v560_v30 }
 0x27b   :  { %825 = vmatmul.mubr.bf16.vlgmr.msra.gmra.mrb[8].mxu1 %v561_v29 }
 0x33e   :  { %v822_v33 = vpop.f32.mrb[16].mxu0 }
 0x33f   :  { %v676_v34 = vadd.f32 %v822_v33, %v747_v32  ;;  %v667_v35 = vpop.f32.mrb[17].mxu0 }
 0x340   :  { %v668_v36 = vadd.f32 %v747_v32, %v667_v35  ;;  %v823_v54 = vpop.f32.mrb[18].mxu0 }
 0x341   :  { %700 = vst [vmem:[%s1396_s8 + $0x10] sm:$0xff] %v676_v34  ;;  %v679_v26 = vadd.f32 %v823_v54, %v747_v32  ;;  %v670_v27 = vpop.f32.mrb[19].mxu0 }
 0x342   :  { %698 = vst [vmem:[%s1396_s8] sm:$0xff] %v668_v36  ;;  %v671_v23 = vadd.f32 %v747_v32, %v670_v27 }
 0x343   :  { %701 = vst [vmem:[%s1396_s8 + $0x18] sm:$0xff] %v679_v26 }
 0x344   :  { %699 = vst [vmem:[%s1396_s8 + $0x8] sm:$0xff] %v671_v23 }
 0x34e   :  { %v826_v24 = vpop.f32.mrb[8].mxu1 }
 0x34f   :  { %v692_v43 = vadd.f32 %v826_v24, %v747_v32  ;;  %v683_v45 = vpop.f32.mrb[9].mxu1 }
 0x350   :  { %v684_v48 = vadd.f32 %v747_v32, %v683_v45  ;;  %v827_v49 = vpop.f32.mrb[10].mxu1 }
 0x351   :  { %704 = vst [vmem:[%s1396_s8 + $0x30] sm:$0xff] %v692_v43  ;;  %v695_v58 = vadd.f32 %v827_v49, %v747_v32  ;;  %v686_v51 = vpop.f32.mrb[11].mxu1 }
 0x352   :  { %702 = vst [vmem:[%s1396_s8 + $0x20] sm:$0xff] %v684_v48  ;;  %v687_v47 = vadd.f32 %v747_v32, %v686_v51 }
 0x353   :  { %705 = vst [vmem:[%s1396_s8 + $0x38] sm:$0xff] %v695_v58 }
 0x354   :  { %703 = vst [vmem:[%s1396_s8 + $0x28] sm:$0xff] %v687_v47 }
 0x355   :  { %710 = vsyncpa [#allocation5], 1 }
 0x356   :  { %711 = vsyncpa [#allocation7], 1 }
 0x357   :  { %712 = vsyncpa [#allocation10], 1 }

</bundles_post_ra>
